<compile_context>
chip_gen: v7x
topology: tpu7x:2x2x1
jax: 0.10.0
libtpu: 0.0.40
codegen_flags: <defaults>
</compile_context>

<pallas_src>
import functools

import numpy as np

import jax
import jax.numpy as jnp
from jax import lax
from jax.experimental import pallas as pl
from jax.experimental.pallas import tpu as pltpu


def _round_up(x, m):
    return (x + m - 1) // m * m


def _fused_nt_xent_kernel(z_ref, loss_ref, *, half, n_full, n_sel,
                          inv_temp_sqrt, ls_vals):
    """Computes NT-Xent loss #i (i = pl.program_id(0)) of the Vikl loss.

    z_ref block: (1, 2*half, D).  Rows [0, half) hold z_i (zero padded past
    the valid count), rows [half, 2*half) hold z_j.  Valid rows per half:
      n_full for losses 0 (img<->text) and 3 (img<->img),
      n_sel  for losses 1 (img<->attr) and 2 (text<->attr).
    Matches torch: CrossEntropyLoss(reduction='sum', label_smoothing=ls) on
    logits [positive | negatives], followed by loss /= N.
    """
    i = pl.program_id(0)
    ls_it, ls_ia, ls_ta, ls_ii = ls_vals

    # Per-loss hyper-parameters selected by grid index (scalar ops only).
    use_sel = jnp.logical_or(i == 1, i == 2)
    nv = jnp.where(use_sel, jnp.int32(n_sel), jnp.int32(n_full))  # valid rows / half
    ls = jnp.where(i == 0, jnp.float32(ls_it),
         jnp.where(i == 1, jnp.float32(ls_ia),
         jnp.where(i == 2, jnp.float32(ls_ta), jnp.float32(ls_ii))))

    n_rows = 2 * half
    z = z_ref[0].astype(jnp.float32)                              # (n_rows, D)

    # Row-validity mask: padded rows must contribute exactly nothing.
    rid = lax.broadcasted_iota(jnp.int32, (n_rows, 1), 0)
    valid = jnp.logical_or(rid < nv,
                           jnp.logical_and(rid >= half, rid < half + nv))
    validf = valid.astype(jnp.float32)                            # (n_rows, 1)

    # Cosine-normalize each row (per-vector norm clamped at 1e-8, like torch),
    # fold sqrt(1/temperature) into both operands, zero out padded rows.
    sq = jnp.sum(z * z, axis=-1, keepdims=True)                   # (n_rows, 1)
    inv_n = lax.rsqrt(jnp.maximum(sq, jnp.float32(1e-16))) * jnp.float32(inv_temp_sqrt)
    zh = z * (inv_n * validf)                                     # (n_rows, D)

    # sim[n, k] = cos(z_n, z_k) / temperature; exactly 0 if n or k is padding.
    # NT-form dot_general: contract the last (lane) axis of both operands.
    sim = lax.dot_general(zh, zh, (((1,), (1,)), ((), ())),
                          preferred_element_type=jnp.float32)     # (n_rows, n_rows)

    diag = jnp.sum(zh * zh, axis=-1, keepdims=True)               # == sim[n, n]
    # Positive logit of pair r appears for row r and row half+r (same value).
    p = jnp.sum(zh[:half, :] * zh[half:, :], axis=-1, keepdims=True)   # (half, 1)
    pos_sum = jnp.sum(p)                                          # pad rows give exactly 0

    # Sum of the valid off-diagonal logits; padded columns are exactly 0.
    rowsum_off = jnp.sum(sim, axis=-1, keepdims=True) - diag

    # Off-diagonal LSE over valid columns only: full-row exp-sum minus the
    # diagonal term and the (n_rows - 2*nv) zero pad columns (exp(-m) each).
    m = jnp.max(sim, axis=-1, keepdims=True)                      # >= diag for valid rows
    es = jnp.sum(jnp.exp(sim - m), axis=-1, keepdims=True)
    n_pad_cols = (n_rows - 2 * nv).astype(jnp.float32)
    es_off = es - n_pad_cols * jnp.exp(-m) - jnp.exp(diag - m)
    lse = m + jnp.log(jnp.maximum(es_off, jnp.float32(1e-30)))

    # Label-smoothed CE (target class 0 = positive), C = N - 1 classes:
    #   per_row = lse - (1-ls)*pos - (ls/C)*sum(logits)
    # The pos term is accumulated as a scalar (each pair counted twice).
    nvf = (2 * nv).astype(jnp.float32)                            # N (valid samples)
    n_classes = nvf - 1.0
    per_row_no_pos = lse - (ls / n_classes) * rowsum_off
    total = (jnp.sum(per_row_no_pos * validf)
             - 2.0 * (1.0 - ls) * pos_sum) / nvf                  # sum-CE / N
    loss_ref[...] = jnp.broadcast_to(total, (1, 1, 1))


def vikl_loss_attr_uni(img_z1, img_z2, text_z, attr_z, attr_uni, *,
                       temperature, ls_it, ls_ia, ls_ta, ls_ii):
    """Vikl_Loss_AttrUni.forward.

    attr_uni is an int32 index vector of static length (the boolean-mask row
    selection of the PyTorch code expressed as integer indices).  Returns
    (loss, met_dict) where met_dict holds JAX scalars (convert with float()
    only after a single block_until_ready if host values are needed).
    """
    b, d = img_z1.shape
    n_sel = int(attr_uni.shape[0])

    # Sublane/lane-aligned padding.  Zero feature columns change neither norms
    # nor dot products; padded rows are masked inside the kernel.
    half = max(_round_up(b, 8), 8)
    d_pad = max(_round_up(d, 128), 128)

    # Row selection is glue: plain-JAX gather outside the kernel.
    img_sel = jnp.take(img_z1, attr_uni, axis=0)
    txt_sel = jnp.take(text_z, attr_uni, axis=0)
    atr_sel = jnp.take(attr_z, attr_uni, axis=0)

    def _pad(x):
        r, c = x.shape
        return jnp.pad(x.astype(jnp.float32), ((0, half - r), (0, d_pad - c)))

    def _pair(zi, zj):
        return jnp.concatenate([_pad(zi), _pad(zj)], axis=0)      # (2*half, d_pad)

    z_all = jnp.stack([
        _pair(img_z1, text_z),      # 0: image <-> text       (n_valid = b)
        _pair(img_sel, atr_sel),    # 1: image <-> attribute  (n_valid = n_sel)
        _pair(txt_sel, atr_sel),    # 2: text  <-> attribute  (n_valid = n_sel)
        _pair(img_z1, img_z2),      # 3: image <-> image      (n_valid = b)
    ], axis=0)                      # (4, 2*half, d_pad)

    kernel = functools.partial(
        _fused_nt_xent_kernel,
        half=half, n_full=b, n_sel=n_sel,
        inv_temp_sqrt=float(1.0 / temperature) ** 0.5,
        ls_vals=(float(ls_it), float(ls_ia), float(ls_ta), float(ls_ii)),
    )

    losses = pl.pallas_call(
        kernel,
        grid=(4,),
        in_specs=[pl.BlockSpec((1, 2 * half, d_pad), lambda i: (i, 0, 0))],
        out_specs=pl.BlockSpec((1, 1, 1), lambda i: (i, 0, 0)),
        out_shape=jax.ShapeDtypeStruct((4, 1, 1), jnp.float32),
        compiler_params=pltpu.CompilerParams(
            dimension_semantics=("parallel",)),
    )(z_all)[:, 0, 0]                                             # (4,)

    loss_i_t, loss_i_a, loss_t_a, loss_i_i = (losses[0], losses[1],
                                              losses[2], losses[3])
    loss_inter_modal = (loss_i_a + loss_i_t + loss_t_a) / 3.0
    loss_intra_modal = loss_i_i
    loss = loss_inter_modal + loss_intra_modal

    met_dict = {
        'loss_i_t': loss_i_t,
        'loss_i_a': loss_i_a,
        'loss_t_a': loss_t_a,
        'loss_intra_modal': loss_intra_modal,
        'loss_sum': loss,
    }
    return loss, met_dict


def _nt_xent_ref(z_i, z_j, temperature, label_smoothing):
    """Pure-numpy (float64) mirror of NT_Xent_AttrUni.forward."""
    z_i = np.asarray(z_i, dtype=np.float64)
    z_j = np.asarray(z_j, dtype=np.float64)
    bs = z_i.shape[0]
    n = 2 * bs
    z = np.concatenate([z_i, z_j], axis=0)
    zn = z / np.maximum(np.linalg.norm(z, axis=-1, keepdims=True), 1e-8)
    sim = (zn @ zn.T) / temperature
    pos = np.concatenate([np.diag(sim, bs), np.diag(sim, -bs)])[:, None]
    mask = np.ones((n, n), dtype=bool)
    np.fill_diagonal(mask, False)
    for r in range(bs):
        mask[r, bs + r] = False
        mask[bs + r, r] = False
    neg = sim[mask].reshape(n, n - 2)
    logits = np.concatenate([pos, neg], axis=1)
    m = logits.max(axis=1, keepdims=True)
    logp = logits - m - np.log(np.exp(logits - m).sum(axis=1, keepdims=True))
    c = n - 1
    eps = label_smoothing
    per_row = -(1.0 - eps) * logp[:, 0] - (eps / c) * logp.sum(axis=1)
    return float(per_row.sum() / n)


if __name__ == "__main__":
    # Module hyper-parameters (the only __init__ state; no weights).
    temperature = 0.5
    ls_it, ls_ia, ls_ta, ls_ii = 0.0, 0.1, 0.1, 0.0

    # Small deterministic inputs.
    B, D = 8, 32
    key = jax.random.PRNGKey(0)
    k1, k2, k3, k4 = jax.random.split(key, 4)
    img_z1 = jax.random.normal(k1, (B, D), dtype=jnp.float32)
    img_z2 = jax.random.normal(k2, (B, D), dtype=jnp.float32)
    text_z = jax.random.normal(k3, (B, D), dtype=jnp.float32)
    attr_z = jax.random.normal(k4, (B, D), dtype=jnp.float32)
    attr_uni = jnp.array([0, 2, 3, 5], dtype=jnp.int32)  # rows with usable attributes

    loss, met = vikl_loss_attr_uni(
        img_z1, img_z2, text_z, attr_z, attr_uni,
        temperature=temperature,
        ls_it=ls_it, ls_ia=ls_ia, ls_ta=ls_ta, ls_ii=ls_ii,
    )
    loss = jax.block_until_ready(loss)
    assert bool(jnp.isfinite(loss)), "loss is not finite"

    # Validate against the pure-numpy (torch-style) reference.
    img_sel_r = np.asarray(img_z1)[np.asarray(attr_uni)]
    txt_sel_r = np.asarray(text_z)[np.asarray(attr_uni)]
    atr_sel_r = np.asarray(attr_z)[np.asarray(attr_uni)]
    ref = {
        'loss_i_t': _nt_xent_ref(img_z1, text_z, temperature, ls_it),
        'loss_i_a': _nt_xent_ref(img_sel_r, atr_sel_r, temperature, ls_ia),
        'loss_t_a': _nt_xent_ref(txt_sel_r, atr_sel_r, temperature, ls_ta),
        'loss_intra_modal': _nt_xent_ref(img_z1, img_z2, temperature, ls_ii),
    }
    ref['loss_sum'] = ((ref['loss_i_a'] + ref['loss_i_t'] + ref['loss_t_a']) / 3.0
                       + ref['loss_intra_modal'])
    for name, want in ref.items():
        got = float(met[name])
        assert abs(got - want) <= 1e-3 + 1e-3 * abs(want), (name, got, want)
    assert abs(float(loss) - ref['loss_sum']) <= 1e-3 + 1e-3 * abs(ref['loss_sum'])

    print("KERNEL_OK")
</pallas_src>

<mosaic_0001>
module attributes {stable_mosaic.version = 11 : i64} {
  func.func @_fused_nt_xent_kernel(%arg0: i32, %arg1: memref<1x16x128xf32, #tpu.memory_space<vmem>>, %arg2: memref<1x1x1xf32, #tpu.memory_space<vmem>>) attributes {dimension_semantics = [#tpu.dimension_semantics<parallel>], iteration_bounds = array<i64: 4>, scalar_prefetch = 0 : i64, scratch_operands = 0 : i64, tpu.core_type = #tpu.core_type<tc>, window_params = [{transform_indices = @transform_0, window_bounds = array<i64: 1, 16, 128>}, {transform_indices = @transform_1, window_bounds = array<i64: 1, 1, 1>}]} {
    %c1_i32 = arith.constant 1 : i32
    %0 = arith.cmpi eq, %arg0, %c1_i32 : i32
    %c2_i32 = arith.constant 2 : i32
    %1 = arith.cmpi eq, %arg0, %c2_i32 : i32
    %2 = arith.ori %0, %1 : i1
    %c4_i32 = arith.constant 4 : i32
    %c8_i32 = arith.constant 8 : i32
    %3 = arith.select %2, %c4_i32, %c8_i32 : i32
    %c0_i32 = arith.constant 0 : i32
    %4 = arith.cmpi eq, %arg0, %c0_i32 : i32
    %c1_i32_0 = arith.constant 1 : i32
    %5 = arith.cmpi eq, %arg0, %c1_i32_0 : i32
    %c2_i32_1 = arith.constant 2 : i32
    %6 = arith.cmpi eq, %arg0, %c2_i32_1 : i32
    %cst = arith.constant 1.000000e-01 : f32
    %cst_2 = arith.constant 0.000000e+00 : f32
    %7 = arith.select %6, %cst, %cst_2 : f32
    %cst_3 = arith.constant 1.000000e-01 : f32
    %8 = arith.select %5, %cst_3, %7 : f32
    %cst_4 = arith.constant 0.000000e+00 : f32
    %9 = arith.select %4, %cst_4, %8 : f32
    %c0 = arith.constant 0 : index
    %c0_5 = arith.constant 0 : index
    %c0_6 = arith.constant 0 : index
    %10 = vector.load %arg1[%c0, %c0_5, %c0_6] : memref<1x16x128xf32, #tpu.memory_space<vmem>>, vector<1x16x128xf32>
    %11 = vector.shape_cast %10 : vector<1x16x128xf32> to vector<16x128xf32>
    %12 = tpu.iota {dimensions = array<i32: 0>} : vector<16x1xi32>
    %13 = vector.broadcast %3 : i32 to vector<16x1xi32>
    %14 = arith.cmpi slt, %12, %13 : vector<16x1xi32>
    %c8_i32_7 = arith.constant 8 : i32
    %15 = vector.broadcast %c8_i32_7 : i32 to vector<16x1xi32>
    %16 = arith.cmpi sge, %12, %15 : vector<16x1xi32>
    %c8_i32_8 = arith.constant 8 : i32
    %17 = arith.addi %c8_i32_8, %3 : i32
    %18 = vector.broadcast %17 : i32 to vector<16x1xi32>
    %19 = arith.cmpi slt, %12, %18 : vector<16x1xi32>
    %20 = arith.andi %16, %19 : vector<16x1xi1>
    %21 = arith.ori %14, %20 : vector<16x1xi1>
    %22 = arith.extui %21 : vector<16x1xi1> to vector<16x1xi32>
    %23 = arith.sitofp %22 : vector<16x1xi32> to vector<16x1xf32>
    %24 = arith.mulf %11, %11 : vector<16x128xf32>
    %cst_9 = arith.constant dense<0.000000e+00> : vector<16xf32>
    %25 = vector.multi_reduction <add>, %24, %cst_9 [1] : vector<16x128xf32> to vector<16xf32>
    %26 = vector.shape_cast %25 : vector<16xf32> to vector<16x1xf32>
    %cst_10 = arith.constant 1.000000e-16 : f32
    %27 = vector.broadcast %cst_10 : f32 to vector<16x1xf32>
    %28 = arith.maximumf %26, %27 : vector<16x1xf32>
    %29 = math.rsqrt %28 : vector<16x1xf32>
    %cst_11 = arith.constant 1.41421354 : f32
    %30 = vector.broadcast %cst_11 : f32 to vector<16x1xf32>
    %31 = arith.mulf %29, %30 : vector<16x1xf32>
    %32 = arith.mulf %31, %23 : vector<16x1xf32>
    %33 = vector.broadcast %32 : vector<16x1xf32> to vector<16x128xf32>
    %34 = arith.mulf %11, %33 : vector<16x128xf32>
    %cst_12 = arith.constant dense<0.000000e+00> : vector<16x16xf32>
    %35 = tpu.matmul %34, %34, %cst_12 {dimension_numbers = #tpu.dot_dimension_numbers<[1], [1], [0], [0], [0, 0, 1, 0], [], []>} : vector<16x128xf32>, vector<16x128xf32>, vector<16x16xf32> -> vector<16x16xf32>
    %36 = arith.mulf %34, %34 : vector<16x128xf32>
    %cst_13 = arith.constant dense<0.000000e+00> : vector<16xf32>
    %37 = vector.multi_reduction <add>, %36, %cst_13 [1] : vector<16x128xf32> to vector<16xf32>
    %38 = vector.shape_cast %37 : vector<16xf32> to vector<16x1xf32>
    %39 = vector.extract_strided_slice %34 {offsets = [0, 0], sizes = [8, 128], strides = [1, 1]} : vector<16x128xf32> to vector<8x128xf32>
    %40 = vector.extract_strided_slice %34 {offsets = [8, 0], sizes = [8, 128], strides = [1, 1]} : vector<16x128xf32> to vector<8x128xf32>
    %41 = arith.mulf %39, %40 : vector<8x128xf32>
    %cst_14 = arith.constant dense<0.000000e+00> : vector<8xf32>
    %42 = vector.multi_reduction <add>, %41, %cst_14 [1] : vector<8x128xf32> to vector<8xf32>
    %43 = vector.shape_cast %42 : vector<8xf32> to vector<8x1xf32>
    %44 = vector.shape_cast %43 : vector<8x1xf32> to vector<1x8x1xf32>
    %cst_15 = arith.constant dense<0.000000e+00> : vector<1xf32>
    %45 = vector.multi_reduction <add>, %44, %cst_15 [1, 2] : vector<1x8x1xf32> to vector<1xf32>
    %46 = vector.shape_cast %45 : vector<1xf32> to vector<1x1x1xf32>
    %47 = vector.extract %46[0, 0, 0] : f32 from vector<1x1x1xf32>
    %cst_16 = arith.constant dense<0.000000e+00> : vector<16xf32>
    %48 = vector.multi_reduction <add>, %35, %cst_16 [1] : vector<16x16xf32> to vector<16xf32>
    %49 = vector.shape_cast %48 : vector<16xf32> to vector<16x1xf32>
    %50 = arith.subf %49, %38 : vector<16x1xf32>
    %cst_17 = arith.constant dense<0xFF800000> : vector<16xf32>
    %51 = vector.multi_reduction <maximumf>, %35, %cst_17 [1] : vector<16x16xf32> to vector<16xf32>
    %52 = vector.shape_cast %51 : vector<16xf32> to vector<16x1xf32>
    %53 = vector.broadcast %52 : vector<16x1xf32> to vector<16x16xf32>
    %54 = arith.subf %35, %53 : vector<16x16xf32>
    %55 = math.exp %54 : vector<16x16xf32>
    %cst_18 = arith.constant dense<0.000000e+00> : vector<16xf32>
    %56 = vector.multi_reduction <add>, %55, %cst_18 [1] : vector<16x16xf32> to vector<16xf32>
    %57 = vector.shape_cast %56 : vector<16xf32> to vector<16x1xf32>
    %c2_i32_19 = arith.constant 2 : i32
    %58 = arith.muli %c2_i32_19, %3 : i32
    %c16_i32 = arith.constant 16 : i32
    %59 = arith.subi %c16_i32, %58 : i32
    %60 = arith.sitofp %59 : i32 to f32
    %cst_20 = arith.constant 0.000000e+00 : f32
    %61 = vector.broadcast %cst_20 : f32 to vector<16x1xf32>
    %62 = arith.subf %61, %52 : vector<16x1xf32>
    %63 = math.exp %62 : vector<16x1xf32>
    %64 = vector.broadcast %60 : f32 to vector<16x1xf32>
    %65 = arith.mulf %64, %63 : vector<16x1xf32>
    %66 = arith.subf %57, %65 : vector<16x1xf32>
    %67 = arith.subf %38, %52 : vector<16x1xf32>
    %68 = math.exp %67 : vector<16x1xf32>
    %69 = arith.subf %66, %68 : vector<16x1xf32>
    %cst_21 = arith.constant 1.000000e-30 : f32
    %70 = vector.broadcast %cst_21 : f32 to vector<16x1xf32>
    %71 = arith.maximumf %69, %70 : vector<16x1xf32>
    %72 = math.log %71 : vector<16x1xf32>
    %73 = arith.addf %52, %72 : vector<16x1xf32>
    %c2_i32_22 = arith.constant 2 : i32
    %74 = arith.muli %c2_i32_22, %3 : i32
    %75 = arith.sitofp %74 : i32 to f32
    %cst_23 = arith.constant 1.000000e+00 : f32
    %76 = arith.subf %75, %cst_23 : f32
    %77 = arith.divf %9, %76 : f32
    %78 = vector.broadcast %77 : f32 to vector<16x1xf32>
    %79 = arith.mulf %78, %50 : vector<16x1xf32>
    %80 = arith.subf %73, %79 : vector<16x1xf32>
    %81 = arith.mulf %80, %23 : vector<16x1xf32>
    %82 = vector.shape_cast %81 : vector<16x1xf32> to vector<1x16x1xf32>
    %cst_24 = arith.constant dense<0.000000e+00> : vector<1xf32>
    %83 = vector.multi_reduction <add>, %82, %cst_24 [1, 2] : vector<1x16x1xf32> to vector<1xf32>
    %84 = vector.shape_cast %83 : vector<1xf32> to vector<1x1x1xf32>
    %85 = vector.extract %84[0, 0, 0] : f32 from vector<1x1x1xf32>
    %cst_25 = arith.constant 1.000000e+00 : f32
    %86 = arith.subf %cst_25, %9 : f32
    %cst_26 = arith.constant 2.000000e+00 : f32
    %87 = arith.mulf %cst_26, %86 : f32
    %88 = arith.mulf %87, %47 : f32
    %89 = arith.subf %85, %88 : f32
    %90 = arith.divf %89, %75 : f32
    %91 = vector.broadcast %90 : f32 to vector<1x1x1xf32>
    %c0_27 = arith.constant 0 : index
    %c0_28 = arith.constant 0 : index
    %c0_29 = arith.constant 0 : index
    %92 = vector.load %arg2[%c0_27, %c0_28, %c0_29] : memref<1x1x1xf32, #tpu.memory_space<vmem>>, vector<1x1x1xf32>
    tpu.vector_store %arg2[%c0_27, %c0_28, %c0_29], %91 {strides = array<i32>} : memref<1x1x1xf32, #tpu.memory_space<vmem>>, vector<1x1x1xf32>,
    return
  }
  func.func @transform_0(%arg0: i32) -> (i32, i32, i32) {
    %c0_i32 = arith.constant 0 : i32
    %c0_i32_0 = arith.constant 0 : i32
    %c0_i32_1 = arith.constant 0 : i32
    return %arg0, %c0_i32, %c0_i32_0 : i32, i32, i32
  }
  func.func @transform_1(%arg0: i32) -> (i32, i32, i32) {
    %c0_i32 = arith.constant 0 : i32
    %c0_i32_0 = arith.constant 0 : i32
    %c0_i32_1 = arith.constant 0 : i32
    return %arg0, %c0_i32, %c0_i32_0 : i32, i32, i32
  }
}

</mosaic_0001>

<bundles_post_ra>
// kernel: tpu_custom_call.1
= control target key start
LH: loop header
LB: loop body
LE: loop exit
PB: predicated region body
PF: predicated region fallthrough
CT: control target
= control target key end

     0   :  { %6 = vsyncpa [#allocation3], 0  ;;  %s781_s0 = inlined_call_operand.hbm [shape: f32[4,16,128], index: 0, kind: input, shape index: {}]   ;;  %s782_s1 = inlined_call_operand.vmem [shape: f32[4,1,1], index: 1, kind: output, shape index: {}]  }
   0x1   :  { %8 = vsyncpa [#allocation3 + $0x1], 0  ;;  %s610_s6 = smov 0   ;;  %s612_s7 = smov 0  }
   0x2   :  { %s614_s8 = smov 0   ;;  %s616_s9 = smov 0  }
   0x3 LB: > { %s629_s10 = sadd.s32 4294967295, %s594_s9   ;;  %s632_s11 = sadd.s32 1, %s594_s9   ;;  %s594_s9 = sphi %s616_s9, %s791_s9   ;;  %s590_s8 = sphi %s614_s8, %s790_s8   ;;  %s586_s7 = sphi %s612_s7, %s789_s7   ;;  %s582_s6 = sphi %s610_s6, %s788_s6  }
   0x4   : > { %s18_s12 = ssub.s32 %s594_s9, %s632_s11  ;;  %s21_s13 = sadd.s32 1, %s590_s8 }
   0x5   : > { %p19_p0 = scmp.eq.s32.totalorder %s18_s12, 0  ;;  %p28_p1 = scmp.ne.s32.totalorder %s590_s8, %s586_s7 }
   0x6   : > { %p29_p2 = scmp.eq.s32.totalorder %s594_s9, 0  ;;  %p34_p3 = scmp.ne.s32.totalorder %s586_s7, %s582_s6 }
   0x7   : > { %s642_s14 = scalar_select %p19_p0, %s590_s8, %s21_s13  }
   0x8   : > { %p30_p4 = por %p29_p2, %p28_p1  ;;  %p783_p5 = scmp.eq.s32.totalorder %s629_s10, 0 }
   0x9   : > { %p470_p6 = scmp.lt.s32.totalorder %s594_s9, 4  ;;  %s84_s16 = sand.u32 1, %s590_s8  }
   0xa   : > { %p648_p7 = por %p783_p5, %p34_p3  ;;  %s429_s17 = sshll.u32 %s84_s16, 4 }
   0xb   : > { %s440_s18 = sshll.u32 %s594_s9, 8  ;;  %s88_s22 = scalar_lea.vmem [#allocation2], %s429_s17 }
   0xc   : > { %s657_s21 = scalar_lea.hbm %s781_s0, %s440_s18  ;;  %s95_s23 = sshll.u32 %s88_s22, 4  ;;  %s659_s23 = int_to_ptr.vmem [resolvable:$true] %s95_s23 }
   0xd   : > { %p661_p8 = pnand %p470_p6, %p30_p4  ;;  %s666_s25 = scalar_lea.sflag [#allocation3], %s84_s16 }
   0xe   : > { %s530_s26 = scalar_lea.hbm %s657_s21, 256  ;;  %s535_s29 = scalar_lea.hbm %s781_s0, 1024 }
   0xf   : > { %p531_p10 = scmp.ne.s32.totalorder %s657_s21, %s530_s26  ;;  %p532_p11 = pneg %p661_p8 }
  0x10   : > { %p536_p0 = scmp.lt.u32.totalorder %s657_s21, %s781_s0  ;;  %p537_p1 = scmp.lt.u32.totalorder %s535_s29, %s530_s26 }
  0x11   : > { %p533_p12 = pnand %p532_p11, %p531_p10  ;;  %p539_p3 = scmp.lt.u32.totalorder %s530_s26, %s657_s21 }
  0x12   : > { %p538_p2 = por %p537_p1, %p536_p0 }
  0x13   : > { %p534_p13 = pneg %p533_p12 }
  0x14   : > { %p540_p4 = por %p539_p3, %p538_p2 }
  0x16   : > { %p541_p6 = pnand %p540_p4, %p534_p13 }
  0x18   : > { %544 = shalt.err (!%p541_p6)
}
  0x19   : > { %s545_s3 = scalar_lea.vmem %s659_s23, 256  ;;  %s596_s4 = smov [#allocation2]  }
  0x1a   : > { %p546_p10 = scmp.ne.s32.totalorder %s659_s23, %s545_s3  ;;  %s550_s5 = sshll.u32 %s596_s4, 4  ;;  %s551_s5 = int_to_ptr.vmem [resolvable:$false] %s550_s5 }
  0x1b   : > { %s552_s6 = scalar_lea.vmem %s551_s5, 512  ;;  %p553_p9 = scmp.lt.s32.totalorder %s659_s23, %s551_s5 }
  0x1c   : > { %p548_p12 = pnand %p546_p10, %p532_p11  ;;  %p554_p0 = scmp.lt.s32.totalorder %s552_s6, %s545_s3 }
  0x1e   : > { %p549_p5 = pneg %p548_p12  ;;  %p555_p1 = por %p554_p0, %p553_p9 }
  0x20   : > { %p556_p2 = pnand %p555_p1, %p549_p5 }
  0x22   : > { %559 = shalt.err (!%p556_p2)
}
  0x23   : > { %s597_s12 = smov 128   ;;  %s598_s13 = smov 8  }
  0x24   : > { %469 = dma.hbm_to_vmem [thread:$0]  (!%p661_p8), %s657_s21, 256, %s659_s23, %s666_s25, %s597_s12, %s597_s12, %s598_s13  }
  0x25   : > { %p103_p11 = scmp.lt.s32.totalorder %s594_s9, 5  ;;  %p786_p13 = scmp.ge.s32.totalorder %s594_s9, 1 }
  0x27   : > { %p104_p3 = pnand %p786_p13, %p103_p11 }
  0x28   : > { %s109_s16 = sand.u32 (!%p104_p3), 1, %s586_s7  }
  0x29   : > { %107 = sbr.rel (%p104_p3) target bundleno = 980 (0x3d4), region = 24  ;;  %s433_s17 = sshll.u32 (!%p104_p3), %s109_s16, 4 }
  0x2a   : > { %s110_s18 = scalar_lea.sflag (!%p104_p3), [#allocation3], %s109_s16  ;;  %s113_s19 = scalar_lea.vmem (!%p104_p3), [#allocation2], %s433_s17 }
  0x30   : > { %577 = dma.done.wait (%p648_p7), %s110_s18, 256  }
  0x31   : > { %579 = vsyncadd (%p648_p7), %s110_s18, 4294967040  ;;  %v141_v0 = vld [vmem:[%s113_s19] sm:$0xff]  ;;  %v142_v1 = vld [vmem:[%s113_s19 + $0x8] sm:$0xff]  ;;  %p133_p5 = scmp.eq.s32.totalorder %s629_s10, 1  ;;  %p134_p8 = scmp.eq.s32.totalorder %s629_s10, 2  ;;  %v143_v4 = vlaneseq  ;;  %v599_v14 = vmov 0.0  }
  0x32   : > { %v163_v2 = vmul.f32 %v141_v0, %v141_v0  ;;  %v164_v3 = vmul.f32 %v142_v1, %v142_v1  ;;  %vm274_vm4 = vcmask 130048   ;;  %vm263_vm5 = vcmask 7168   ;;  %p787_p7 = scmp.eq.s32.totalorder %s629_s10, 0  ;;  %p130_p4 = scmp.lt.s32.totalorder %s629_s10, 3 }
  0x33   : > { %p135_p9 = por %p134_p8, %p133_p5  ;;  %v144_v7 = vshrl.u32 %v143_v4, 7  ;;  %vm365_vm6 = vcmask 0  }
  0x34   : > { %165 = vadd.xlane.f32.xlu0 %v163_v2  ;;  %s138_s25 = scalar_select %p134_p8, 0.1, 0.0 }
  0x35   : > { %s708_s9 = scalar_select %p135_p9, 4, 8  ;;  %v145_v11 = vadd.s32 8, %v144_v7 }
  0x36   : > { %s793_s25 = smov (%p133_p5, %s138_s25), 0.1  ;;  %s797_s10 = smov (!%p130_p4, %s629_s10), 3 }
  0x37   : > { %s151_s15 = sadd.s32 8, %s708_s9  ;;  %v146_v10 = vstv %s708_s9  ;;  %s436_s20 = sshll.u32 %s708_s9, 1 }
  0x38   : > { %167 = vadd.xlane.f32.xlu0 %v164_v3  ;;  %v152_v12 = vstv %s151_s15  ;;  %vm147_vm0 = vcmp.lt.s32.totalorder %v144_v7, %v146_v10  ;;  %vm148_vm1 = vcmp.lt.s32.totalorder %v145_v11, %v146_v10  ;;  %s724_s21 = scvt.s32.f32 %s436_s20  ;;  %s302_s23 = ssub.s32 16, %s436_s20 }
  0x39   : > { %vm154_vm2 = vcmp.lt.s32.totalorder %v145_v11, %v152_v12  ;;  %v712_v15 = vsel %vm147_vm0, 1.0, %v599_v14  ;;  %s303_s24 = scvt.s32.f32 %s302_s23  ;;  %s795_s25 = smov (%p787_p7, %s793_s25), 0.0 }
  0x3a   : > { %vm158_vm3 = vmor %vm148_vm1, %vm154_vm2  ;;  %s437_s22 = sadd.f32 -1.0, %s724_s21  ;;  %s132_s13 = scalar_lea.vmem %s782_s1, %s797_s10 }
  0x3b   : > { %v715_v19 = vsel %vm158_vm3, 1.0, %v599_v14  ;;  %v310_v2 = vstv %s303_s24  ;;  %s356_s29 = ssub.f32 1.0, %s795_s25 }
  0x3c   : > { %v333_v39 = vstv %s437_s22 }
  0x3d   : > { %s357_s30 = smul.f32 2.0, %s356_s29 }
  0xc1   : > { %v166_v5 = vpop.xlane.xlu0 %165 }
  0xc2   : > { %v169_v6 = vmax.f32 %v166_v5, 1e-16 }
  0xc4   : > { %506 = vrsqrt.f32 %v169_v6 }
  0xc5   : > { %v168_v8 = vpop.xlane.xlu0 %167 }
  0xc6   : > { %v170_v9 = vmax.f32 %v168_v8, 1e-16 }
  0xc8   : > { %508 = vrsqrt.f32 %v170_v9 }
  0xce   : > { %v507_v13 = vpop.eup %506 }
  0xcf   : > { %v173_v16 = vmul.f32 1.4142135, %v507_v13 }
  0xd1   : > { %v175_v17 = vmul.f32 %v712_v15, %v173_v16 }
  0xd2   : > { %v509_v18 = vpop.eup %508 }
  0xd3   : > { %v174_v20 = vmul.f32 1.4142135, %v509_v18  ;;  %v177_v21 = vmul.f32 %v175_v17, %v141_v0 }
  0xd5   : > { %v176_v22 = vmul.f32 %v715_v19, %v174_v20  ;;  %449 = vmatprep.mubr.f32.mxu0 %v177_v21  ;;  %v254_v31 = vmul.f32 %v177_v21, %v177_v21 }
  0xd7   : > { %v178_v23 = vmul.f32 %v176_v22, %v142_v1 }
  0xd9   : > { %v260_v24 = vmul.f32 %v178_v23, %v177_v21  ;;  %v452_v25 = vpack.c.bf16 %v178_v23, %v177_v21  ;;  %v255_v33 = vmul.f32 %v178_v23, %v178_v23 }
  0xdb   : > { %261 = vadd.xlane.f32.xlu1 %v260_v24  ;;  %453 = vmatprep.subr.bf16.mxu0 %v452_v25 }
  0xdc   : > { %455 = vmatpush3.bf16.xpose.msra.mxu0 %v452_v25 }
  0xe3   : > { %450 = vmatmul.mubr.f32.vlgmr.msra.gmra.mrb[0].mxu0 %v178_v23 }
 0x168   : > { %v262_v30 = vpop.xlane.xlu1 %261 }
 0x169   : > { %v264_v32 = vsel %vm263_vm5, %v262_v30, 0.0 }
 0x1b6   : > { %v451_v26 = vpop.f32.mrb[0].mxu0 }
 0x1b7   : > { %v245_v27 = vpop.f32.mrb[1].mxu0  ;;  %v286_v28 = vsel %vm274_vm4, %v451_v26, -inf  ;;  %v278_v53 = vsel %vm274_vm4, %v451_v26, 0.0 }
 0x1b8   : > { %287 = vmax.xlane.f32.xlu0 %v286_v28  ;;  %v283_v29 = vsel %vm274_vm4, %v245_v27, -inf  ;;  %v275_v54 = vsel %vm274_vm4, %v245_v27, 0.0 }
 0x1b9   : > { %284 = vmax.xlane.f32.xlu1 %v283_v29 }
 0x1bc   : > { %256 = vadd.xlane.f32.xlu0 %v254_v31 }
 0x1bd   : > { %265 = vadd.xlane.f32.xlu1 %v264_v32 }
 0x1c1   : > { %258 = vadd.xlane.f32.xlu1 %v255_v33 }
 0x245   : > { %v727_v34 = vpop.xlane.xlu0 %287 }
 0x246   : > { %v290_v35 = vsub.f32 %v451_v26, %v727_v34  ;;  %v730_v36 = vpop.xlane.xlu1 %284  ;;  %v305_v55 = vsub.f32 0.0, %v727_v34 }
 0x247   : > { %v289_v37 = vsub.f32 %v245_v27, %v730_v36  ;;  %v304_v56 = vsub.f32 0.0, %v730_v36 }
 0x248   : > { %v293_v38 = vmul.f32 1.442695, %v290_v35  ;;  %v308_v58 = vmul.f32 1.442695, %v305_v55 }
 0x249   : > { %v291_v40 = vmul.f32 1.442695, %v289_v37  ;;  %v257_v59 = vpop.xlane.xlu0 %256  ;;  %v306_v60 = vmul.f32 1.442695, %v304_v56 }
 0x24a   : > { %510 = vpow2.f32 %v293_v38  ;;  %v266_v41 = vpop.xlane.xlu1 %265  ;;  %v315_v62 = vsub.f32 %v257_v59, %v730_v36 }
 0x24b   : > { %v267_v42 = vrot.slane %v266_v41, 4  ;;  %512 = vrcp.f32 %v333_v39 }
 0x24c   : > { %514 = vpow2.f32 %v291_v40  ;;  %v317_v0 = vmul.f32 1.442695, %v315_v62 }
 0x24d   : > { %v268_v43 = vadd.f32 %v267_v42, %v266_v41  ;;  %516 = vpow2.f32 %v308_v58 }
 0x24e   : > { %v259_v57 = vpop.xlane.xlu1 %258  ;;  %518 = vpow2.f32 %v306_v60 }
 0x24f   : > { %v269_v44 = vrot.slane %v268_v43, 2  ;;  %v316_v61 = vsub.f32 %v259_v57, %v727_v34 }
 0x251   : > { %v270_v45 = vadd.f32 %v269_v44, %v268_v43  ;;  %v319_v63 = vmul.f32 1.442695, %v316_v61 }
 0x253   : > { %v271_v46 = vrot.slane %v270_v45, 1  ;;  %520 = vpow2.f32 %v319_v63 }
 0x254   : > { %v511_v47 = vpop.eup %510  ;;  %522 = vpow2.f32 %v317_v0 }
 0x255   : > { %v513_v48 = vpop.eup %512  ;;  %v298_v49 = vsel %vm274_vm4, %v511_v47, 0.0  ;;  %v272_v50 = vadd.f32 %v271_v46, %v270_v45 }
 0x256   : > { %v515_v51 = vpop.eup %514  ;;  %299 = vadd.xlane.f32.xlu1 %v298_v49 }
 0x257   : > { %v295_v52 = vsel %vm274_vm4, %v515_v51, 0.0  ;;  %456 = vpush %v272_v50  ;;  %v517_v1 = vpop.eup %516 }
 0x258   : > { %296 = vadd.xlane.f32.xlu0 %v295_v52  ;;  %458 = vpush %v513_v48  ;;  %v519_v3 = vpop.eup %518  ;;  %v312_v4 = vmul.f32 %v517_v1, %v310_v2 }
 0x259   : > { %v311_v7 = vmul.f32 %v519_v3, %v310_v2 }
 0x25a   : > { %279 = vadd.xlane.f32.xlu1 %v278_v53 }
 0x25c   : > { %276 = vadd.xlane.f32.xlu0 %v275_v54 }
 0x25d   : > { %v521_v8 = vpop.eup %520 }
 0x25e   : > { %v523_v12 = vpop.eup %522 }
 0x288   : > { %s747_s26 = spop %456 }
 0x289   : > { %s459_s27 = spop %458  ;;  %s358_s2 = smul.f32 %s747_s26, %s357_s30 }
 0x28a   : > { %s336_s28 = smul.f32 %s459_s27, %s795_s25 }
 0x28c   : > { %v337_v22 = vstv %s336_s28 }
 0x2e3   : > { %v300_v5 = vpop.xlane.xlu1 %299 }
 0x2e4   : > { %v314_v6 = vsub.f32 %v300_v5, %v312_v4 }
 0x2e5   : > { %v297_v9 = vpop.xlane.xlu0 %296 }
 0x2e6   : > { %v322_v10 = vsub.f32 %v314_v6, %v521_v8  ;;  %v313_v11 = vsub.f32 %v297_v9, %v311_v7 }
 0x2e7   : > { %v280_v17 = vpop.xlane.xlu1 %279 }
 0x2e8   : > { %v324_v13 = vmax.f32 %v322_v10, 1e-30  ;;  %v321_v14 = vsub.f32 %v313_v11, %v523_v12  ;;  %v282_v20 = vsub.f32 %v280_v17, %v259_v57 }
 0x2e9   : > { %v277_v18 = vpop.xlane.xlu0 %276 }
 0x2ea   : > { %524 = vlog2.f32 %v324_v13  ;;  %v323_v16 = vmax.f32 %v321_v14, 1e-30  ;;  %v281_v24 = vsub.f32 %v277_v18, %v257_v59  ;;  %v339_v28 = vmul.f32 %v337_v22, %v282_v20 }
 0x2ec   : > { %526 = vlog2.f32 %v323_v16  ;;  %v338_v31 = vmul.f32 %v337_v22, %v281_v24 }
 0x2f4   : > { %v525_v21 = vpop.eup %524 }
 0x2f5   : > { %v328_v23 = vmul.f32 0.6931472, %v525_v21 }
 0x2f6   : > { %v527_v25 = vpop.eup %526 }
 0x2f7   : > { %v326_v26 = vmul.f32 0.6931472, %v527_v25  ;;  %v330_v27 = vadd.f32 %v328_v23, %v727_v34  ;;  %v360_v34 = vstv %s724_s21 }
 0x2f8   : > { %528 = vrcp.f32 %v360_v34 }
 0x2f9   : > { %v341_v29 = vsub.f32 %v330_v27, %v339_v28  ;;  %v329_v30 = vadd.f32 %v326_v26, %v730_v36 }
 0x2fb   : > { %v340_v32 = vsub.f32 %v329_v30, %v338_v31  ;;  %v343_v33 = vmul.f32 %v715_v19, %v341_v29 }
 0x2fd   : > { %v342_v35 = vmul.f32 %v712_v15, %v340_v32  ;;  %v345_v37 = vsel %vm263_vm5, %v343_v33, 0.0 }
 0x2ff   : > { %v344_v38 = vsel %vm263_vm5, %v342_v35, 0.0 }
 0x300   : > { %v346_v39 = vadd.f32 %v345_v37, %v344_v38 }
 0x302   : > { %347 = vadd.xlane.f32.xlu0 %v346_v39  ;;  %v529_v44 = vpop.eup %528 }
 0x38f   : > { %v348_v40 = vpop.xlane.xlu0 %347 }
 0x390   : > { %v349_v41 = vrot.slane %v348_v40, 4 }
 0x392   : > { %v350_v36 = vadd.f32 %v349_v41, %v348_v40 }
 0x394   : > { %v351_v42 = vrot.slane %v350_v36, 2 }
 0x396   : > { %v352_v43 = vadd.f32 %v351_v42, %v350_v36 }
 0x398   : > { %v353_v19 = vrot.slane %v352_v43, 1 }
 0x39a   : > { %v354_v15 = vadd.f32 %v353_v19, %v352_v43 }
 0x39c   : > { %460 = vpush %v354_v15 }
 0x39d   : > { %462 = vpush %v529_v44 }
 0x3cd   : > { %s461_s3 = spop %460 }
 0x3ce   : > { %s359_s4 = ssub.f32 %s461_s3, %s358_s2  ;;  %s463_s5 = spop %462 }
 0x3d0   : > { %s363_s16 = smul.f32 %s463_s5, %s359_s4 }
 0x3d2   : > { %v364_v45 = vstv %s363_s16 }
 0x3d3   : > { %366 = vst.msk [vmem:[%s132_s13] sm:$0x1] %vm365_vm6, %v364_v45 }
 0x3d4 PF: > { %p11_p6 = scmp.ge.s32.totalorder %s632_s11, 6   ;;  %s788_s6 = smov %s586_s7 }
 0x3d5   : > { %s789_s7 = smov %s590_s8  ;;  %s790_s8 = smov %s642_s14 }
 0x3d6   : > { %s791_s9 = smov %s632_s11  ;;  %13 = sbr.rel (!%p11_p6) target bundleno = 3 (0x3), region = 64 }
 0x3dd   :  { %384 = vsyncpa [#allocation3], 1 }
 0x3de   :  { %386 = vsyncpa [#allocation3 + $0x1], 1 }

</bundles_post_ra>
